<compile_context>
chip_gen: v6e
topology: v6e:2x2x1
jax: 0.10.0
libtpu: 0.0.40
codegen_flags: <defaults>
</compile_context>

<pallas_src>
import functools

import numpy as np
import jax
import jax.numpy as jnp
from jax.experimental import pallas as pl
from jax.experimental.pallas import tpu as pltpu

NEG_SLOPE = 0.2       # nn.LeakyReLU(negative_slope=0.2)
NEG_INF = -1e30       # large-but-finite; exp(NEG_INF - finite) flushes to 0 in f32


def _vmem_budget():
    """Generation-dependent scoped-VMEM limit (<=48 MiB on v7x, ~96 MiB on v5e/v6e)."""
    try:
        cap = int(pltpu.get_tpu_info().vmem_capacity_bytes)
    except Exception:
        cap = 64 * 1024 * 1024           # conservative (v7x-sized) fallback
    return cap, min(cap * 3 // 4, 100 * 1024 * 1024)


# ----------------------------------------------------------------------------
# Stage 1: fused, precision-split projection.
#   featp  = bf16(x_aug) @ bf16(Wf)   -> per-head [feat_h | 1]   (bf16 out)
#   scores = f32 (x_aug) @ f32 (Ws)   -> [el | er]               (f32 out)
# ----------------------------------------------------------------------------
def _proj_kernel(x_ref, wf_ref, ws_ref, featp_ref, sc_ref):
    x = x_ref[...]                                           # (tn, Din+1) f32
    # Big matmul on the bf16 MXU path (3-4x faster than f32 multi-pass); feat
    # is consumed in bf16 downstream anyway.
    featp_ref[...] = jnp.dot(x.astype(jnp.bfloat16), wf_ref[...],
                             preferred_element_type=jnp.float32
                             ).astype(featp_ref.dtype)
    # el/er feed exp(): keep f32 inputs for this tiny (Din+1, 2H) matmul.
    sc_ref[...] = jnp.dot(x, ws_ref[...], preferred_element_type=jnp.float32)


# ----------------------------------------------------------------------------
# Stage 2: online (flash-style) edge softmax + spmm.
#   grid = (dst tiles ["parallel"], src tiles ["arbitrary"])
# ----------------------------------------------------------------------------
def _attn_kernel(featp_ref, elt_ref, er_ref, adj_ref, bias_ref, out_ref,
                 m_sc, acc_sc, *, num_heads, out_feats, hf, hf_pad):
    H, F = num_heads, out_feats
    j = pl.program_id(1)

    @pl.when(j == 0)
    def _():
        m_sc[...] = jnp.full_like(m_sc, NEG_INF)
        acc_sc[...] = jnp.zeros_like(acc_sc)

    mask = adj_ref[...] != 0                 # (T,S) bool straight from int8 (no f32 copy)
    er = er_ref[...]                         # (T, H) f32
    elt = elt_ref[...]                       # (H, S) f32 (el transposed once, in wrapper)
    featp = featp_ref[...]                   # (S, H*(F+1)) bf16

    for h in range(H):                       # small static head loop
        base = h * (F + 1)
        e = er[:, h:h + 1] + elt[h:h + 1, :]                  # (T, S)
        e = jnp.where(e > 0, e, NEG_SLOPE * e)                # leaky_relu
        e = jnp.where(mask, e, NEG_INF)                       # edges only
        row_max = jnp.max(e, axis=-1, keepdims=True)          # (T, 1)
        m_old = m_sc[:, h:h + 1]
        m_new = jnp.maximum(m_old, row_max)
        alpha = jnp.exp(m_old - m_new)                        # (T, 1)
        # No post-exp mask select: exp(NEG_INF - m_new) == 0 exactly once m_new
        # is a real (finite) score.
        p = jnp.exp(e - m_new)                                # (T, S)
        # Rows with no edge in THIS src tile (m_new still NEG_INF) would see
        # p == 1 everywhere; gate their contribution with a (T,1) factor
        # instead of a full (T,S) select.
        valid = (row_max > 0.5 * NEG_INF).astype(jnp.float32)  # (T, 1)
        # Aggregate AND softmax denominator in one bf16 MXU pass (ones column
        # folded into featp), f32 accumulation; no XLU sum-reduce.
        contrib = jnp.dot(p.astype(jnp.bfloat16),
                          featp[:, base:base + F + 1],
                          preferred_element_type=jnp.float32)  # (T, F+1)
        acc_sc[:, base:base + F + 1] = (alpha * acc_sc[:, base:base + F + 1]
                                        + valid * contrib)
        m_sc[:, h:h + 1] = m_new

    @pl.when(j == pl.num_programs(1) - 1)
    def _():
        bias = bias_ref[...]                                  # (1, HF_pad)
        for h in range(H):
            base = h * (F + 1)
            agg = acc_sc[:, base:base + F]                    # (T, F)
            denom = acc_sc[:, base + F:base + F + 1]          # (T, 1)
            inv = pl.reciprocal(jnp.maximum(denom, 1e-30), approx=True)  # EUP
            out_ref[:, h * F:(h + 1) * F] = agg * inv + bias[:, h * F:(h + 1) * F]
        if hf_pad > hf:                                       # static
            out_ref[:, hf:] = jnp.zeros((out_ref.shape[0], hf_pad - hf),
                                        out_ref.dtype)


def qgat_forward(x, adj, w, attn_l, attn_r, bias, num_heads, out_feats,
                 *, dst_tile=None, src_tile=None):
    """x: (N, Din) f32, adj: (N, N) {0,1}, w: (Din, H*F), attn_*: (1,H,F), bias: (H*F,).

    NOTE: like the PyTorch module (allow_zero_in_degree=False), every real dst
    node is assumed to have in-degree >= 1.
    """
    N, din = x.shape
    H, F = num_heads, out_feats
    HF = H * F
    HFp = H * (F + 1)                        # per-head [feat | 1] layout width
    HF_pad = max(128, ((HF + 127) // 128) * 128)   # lane-dense output width

    # ---- generation-dependent budgets / tiles ----
    vmem_cap, vmem_limit = _vmem_budget()
    tile_target = 512 if vmem_cap >= 100 * 1024 * 1024 else 256   # v5e/v6e vs v7x
    if dst_tile is None:
        dst_tile = tile_target
    if src_tile is None:
        src_tile = tile_target

    # ---- pad N up to a multiple of 128 (no exact-divisor tile search) ----
    Np = ((N + 127) // 128) * 128

    def _tile(target):
        for t in (512, 384, 256, 128):
            if t <= target and Np % t == 0:
                return t
        return 128                           # 128 always divides Np
    td = _tile(dst_tile)                     # dst tile (stage 2)
    ts = _tile(src_tile)                     # src tile (stage 2)
    tn = td                                  # node tile (stage 1)

    # ---- fold el/er reductions + the denominator "ones" column into weights ----
    w_h = w.reshape(din, H, F)
    w_el = jnp.einsum('dhf,hf->dh', w_h, attn_l.reshape(H, F))   # (Din, H)
    w_er = jnp.einsum('dhf,hf->dh', w_h, attn_r.reshape(H, F))   # (Din, H)
    ws = jnp.concatenate([w_el, w_er], axis=1)                   # (Din, 2H)
    ws = jnp.concatenate([ws, jnp.zeros((1, 2 * H), ws.dtype)], axis=0)  # ones row -> 0

    wf = jnp.concatenate([w_h, jnp.zeros((din, H, 1), w.dtype)], axis=-1)  # (Din,H,F+1)
    ones_row = jnp.concatenate([jnp.zeros((1, H, F), w.dtype),
                                jnp.ones((1, H, 1), w.dtype)], axis=-1)    # (1,H,F+1)
    wf = jnp.concatenate([wf, ones_row], axis=0).reshape(din + 1, HFp)
    wf = wf.astype(jnp.bfloat16)

    # x augmented with a constant-1 feature (generates the ones columns), padded.
    x_aug = jnp.concatenate([x, jnp.ones((N, 1), x.dtype)], axis=1)
    x_aug = jnp.pad(x_aug, ((0, Np - N), (0, 0)))

    # ---- Stage 1: projection ----
    featp, scores = pl.pallas_call(
        _proj_kernel,
        out_shape=(jax.ShapeDtypeStruct((Np, HFp), jnp.bfloat16),
                   jax.ShapeDtypeStruct((Np, 2 * H), jnp.float32)),
        grid_spec=pltpu.PrefetchScalarGridSpec(
            num_scalar_prefetch=0,
            grid=(Np // tn,),
            in_specs=[
                pl.BlockSpec((tn, din + 1), lambda i: (i, 0)),
                pl.BlockSpec((din + 1, HFp), lambda i: (0, 0)),
                pl.BlockSpec((din + 1, 2 * H), lambda i: (0, 0)),
            ],
            out_specs=[
                pl.BlockSpec((tn, HFp), lambda i: (i, 0)),
                pl.BlockSpec((tn, 2 * H), lambda i: (i, 0)),
            ],
        ),
        compiler_params=pltpu.CompilerParams(
            dimension_semantics=("parallel",),
            vmem_limit_bytes=vmem_limit),
    )(x_aug, wf, ws)

    el_t = jnp.transpose(scores[:, :H])      # (H, Np): transposed ONCE, outside kernel
    er = scores[:, H:]                       # (Np, H)  (tiny block; fine as-is)
    adj_i8 = jnp.pad(adj.astype(jnp.int8), ((0, Np - N), (0, Np - N)))
    bias_row = jnp.pad(bias.reshape(1, HF), ((0, 0), (0, HF_pad - HF)))

    # ---- Stage 2: online edge softmax + aggregation ----
    out = pl.pallas_call(
        functools.partial(_attn_kernel, num_heads=H, out_feats=F,
                          hf=HF, hf_pad=HF_pad),
        out_shape=jax.ShapeDtypeStruct((Np, HF_pad), jnp.float32),
        grid_spec=pltpu.PrefetchScalarGridSpec(
            num_scalar_prefetch=0,
            grid=(Np // td, Np // ts),
            in_specs=[
                pl.BlockSpec((ts, HFp), lambda i, j: (j, 0)),     # featp src tile (bf16)
                pl.BlockSpec((H, ts), lambda i, j: (0, j)),       # el^T src tile
                pl.BlockSpec((td, H), lambda i, j: (i, 0)),       # er dst tile
                pl.BlockSpec((td, ts), lambda i, j: (i, j)),      # adjacency tile (int8)
                pl.BlockSpec((1, HF_pad), lambda i, j: (0, 0)),   # bias (padded)
            ],
            out_specs=pl.BlockSpec((td, HF_pad), lambda i, j: (i, 0)),
            scratch_shapes=[pltpu.VMEM((td, H), jnp.float32),     # running max
                            pltpu.VMEM((td, HFp), jnp.float32)],  # [acc | denom] per head
        ),
        compiler_params=pltpu.CompilerParams(
            # dst axis "parallel" so v7x's 2 TensorCores get disjoint dst tiles.
            dimension_semantics=("parallel", "arbitrary"),
            vmem_limit_bytes=vmem_limit),
    )(featp, el_t, er, adj_i8, bias_row)

    return out[:N, :HF].reshape(N, H, F)     # slice padding, pure reshape


def qgat_reference(x, adj, w, attn_l, attn_r, bias, num_heads, out_feats):
    """Pure-JAX f32 reference mirroring the PyTorch forward."""
    N, din = x.shape
    H, F = num_heads, out_feats
    feat = (x @ w).reshape(N, H, F)
    el = jnp.sum(feat * attn_l.reshape(1, H, F), axis=-1)    # (N, H)
    er = jnp.sum(feat * attn_r.reshape(1, H, F), axis=-1)    # (N, H)
    e = er[:, None, :] + el[None, :, :]                      # (dst, src, H)
    e = jnp.where(e > 0, e, NEG_SLOPE * e)
    mask = (adj > 0)[:, :, None]
    e = jnp.where(mask, e, -jnp.inf)
    a = jax.nn.softmax(e, axis=1)
    a = jnp.where(mask, a, 0.0)
    rst = jnp.einsum('dsh,shf->dhf', a, feat)
    return rst + bias.reshape(1, H, F)


if __name__ == "__main__":
    # Small shapes consistent with the module: N nodes, in_feats, out_feats, heads.
    N, IN_FEATS, OUT_FEATS, NUM_HEADS = 16, 32, 8, 4

    key = jax.random.PRNGKey(0)
    kx, kw, kl, kr, ke = jax.random.split(key, 5)

    x = jax.random.normal(kx, (N, IN_FEATS), jnp.float32)

    # Deterministic parameter init (xavier_normal-like with gain=sqrt(2), bias=0).
    gain = float(np.sqrt(2.0))
    std_w = gain * float(np.sqrt(2.0 / (IN_FEATS + NUM_HEADS * OUT_FEATS)))
    w = std_w * jax.random.normal(kw, (IN_FEATS, NUM_HEADS * OUT_FEATS), jnp.float32)
    std_a = gain * float(np.sqrt(2.0 / (NUM_HEADS + OUT_FEATS)))
    attn_l = std_a * jax.random.normal(kl, (1, NUM_HEADS, OUT_FEATS), jnp.float32)
    attn_r = std_a * jax.random.normal(kr, (1, NUM_HEADS, OUT_FEATS), jnp.float32)
    bias = jnp.zeros((NUM_HEADS * OUT_FEATS,), jnp.float32)  # constant_(0)

    # Synthetic graph: self-loops + ring + a few random edges (every node has
    # in-degree >= 1, matching the module's zero-in-degree requirement).
    adj_np = np.zeros((N, N), np.float32)
    for i in range(N):
        adj_np[i, i] = 1.0                 # self loop
        adj_np[i, (i + 1) % N] = 1.0       # ring edge src=(i+1) -> dst=i
    rand_edges = np.array(jax.random.bernoulli(ke, 0.2, (N, N)), np.float32)
    adj_np = np.clip(adj_np + rand_edges, 0.0, 1.0)
    assert (adj_np.sum(axis=1) > 0).all(), "0-in-degree node (module would raise)"
    adj = jnp.asarray(adj_np)

    out = qgat_forward(x, adj, w, attn_l, attn_r, bias, NUM_HEADS, OUT_FEATS)
    out = jax.block_until_ready(out)

    ref = qgat_reference(x, adj, w, attn_l, attn_r, bias, NUM_HEADS, OUT_FEATS)
    ref = jax.block_until_ready(ref)

    assert out.shape == (N, NUM_HEADS, OUT_FEATS)
    # Tolerance relaxed vs pure-f32 (bf16 projection inputs, bf16 p/feat in the
    # spmm, approximate reciprocal), as sanctioned in the performance review.
    np.testing.assert_allclose(np.asarray(out), np.asarray(ref), atol=3e-2, rtol=3e-2)
    print("KERNEL_OK")
</pallas_src>

<mosaic_0001>
module attributes {stable_mosaic.version = 11 : i64} {
  func.func @_proj_kernel(%arg0: i32, %arg1: memref<128x33xf32, #tpu.memory_space<vmem>>, %arg2: memref<33x36xbf16, #tpu.memory_space<vmem>>, %arg3: memref<33x8xf32, #tpu.memory_space<vmem>>, %arg4: memref<128x36xbf16, #tpu.memory_space<vmem>>, %arg5: memref<128x8xf32, #tpu.memory_space<vmem>>) attributes {dimension_semantics = [#tpu.dimension_semantics<parallel>], iteration_bounds = array<i64: 1>, scalar_prefetch = 0 : i64, scratch_operands = 0 : i64, tpu.core_type = #tpu.core_type<tc>, window_params = [{transform_indices = @transform_0, window_bounds = array<i64: 128, 33>}, {pipeline_mode = #tpu.pipeline_mode<synchronous>, transform_indices = @transform_1, window_bounds = array<i64: 33, 36>}, {pipeline_mode = #tpu.pipeline_mode<synchronous>, transform_indices = @transform_2, window_bounds = array<i64: 33, 8>}, {transform_indices = @transform_3, window_bounds = array<i64: 128, 36>}, {transform_indices = @transform_4, window_bounds = array<i64: 128, 8>}]} {
    %c0 = arith.constant 0 : index
    %c0_0 = arith.constant 0 : index
    %0 = vector.load %arg1[%c0, %c0_0] : memref<128x33xf32, #tpu.memory_space<vmem>>, vector<128x33xf32>
    %1 = arith.truncf %0 : vector<128x33xf32> to vector<128x33xbf16>
    %c0_1 = arith.constant 0 : index
    %c0_2 = arith.constant 0 : index
    %2 = vector.load %arg2[%c0_1, %c0_2] : memref<33x36xbf16, #tpu.memory_space<vmem>>, vector<33x36xbf16>
    %cst = arith.constant dense<0.000000e+00> : vector<128x36xf32>
    %3 = tpu.matmul %1, %2, %cst {dimension_numbers = #tpu.dot_dimension_numbers<[1], [0], [0], [1], [0, 0, 1, 1], [], []>} : vector<128x33xbf16>, vector<33x36xbf16>, vector<128x36xf32> -> vector<128x36xf32>
    %4 = arith.truncf %3 : vector<128x36xf32> to vector<128x36xbf16>
    %c0_3 = arith.constant 0 : index
    %c0_4 = arith.constant 0 : index
    %5 = vector.load %arg4[%c0_3, %c0_4] : memref<128x36xbf16, #tpu.memory_space<vmem>>, vector<128x36xbf16>
    tpu.vector_store %arg4[%c0_3, %c0_4], %4 {strides = array<i32>} : memref<128x36xbf16, #tpu.memory_space<vmem>>, vector<128x36xbf16>,
    %c0_5 = arith.constant 0 : index
    %c0_6 = arith.constant 0 : index
    %6 = vector.load %arg3[%c0_5, %c0_6] : memref<33x8xf32, #tpu.memory_space<vmem>>, vector<33x8xf32>
    %cst_7 = arith.constant dense<0.000000e+00> : vector<128x8xf32>
    %7 = tpu.matmul %0, %6, %cst_7 {dimension_numbers = #tpu.dot_dimension_numbers<[1], [0], [0], [1], [0, 0, 1, 1], [], []>} : vector<128x33xf32>, vector<33x8xf32>, vector<128x8xf32> -> vector<128x8xf32>
    %c0_8 = arith.constant 0 : index
    %c0_9 = arith.constant 0 : index
    %8 = vector.load %arg5[%c0_8, %c0_9] : memref<128x8xf32, #tpu.memory_space<vmem>>, vector<128x8xf32>
    tpu.vector_store %arg5[%c0_8, %c0_9], %7 {strides = array<i32>} : memref<128x8xf32, #tpu.memory_space<vmem>>, vector<128x8xf32>,
    return
  }
  func.func @transform_0(%arg0: i32) -> (i32, i32) {
    %c0_i32 = arith.constant 0 : i32
    %c0_i32_0 = arith.constant 0 : i32
    return %arg0, %c0_i32 : i32, i32
  }
  func.func @transform_1(%arg0: i32) -> (i32, i32) {
    %c0_i32 = arith.constant 0 : i32
    %c0_i32_0 = arith.constant 0 : i32
    %c0_i32_1 = arith.constant 0 : i32
    return %c0_i32, %c0_i32_0 : i32, i32
  }
  func.func @transform_2(%arg0: i32) -> (i32, i32) {
    %c0_i32 = arith.constant 0 : i32
    %c0_i32_0 = arith.constant 0 : i32
    %c0_i32_1 = arith.constant 0 : i32
    return %c0_i32, %c0_i32_0 : i32, i32
  }
  func.func @transform_3(%arg0: i32) -> (i32, i32) {
    %c0_i32 = arith.constant 0 : i32
    %c0_i32_0 = arith.constant 0 : i32
    return %arg0, %c0_i32 : i32, i32
  }
  func.func @transform_4(%arg0: i32) -> (i32, i32) {
    %c0_i32 = arith.constant 0 : i32
    %c0_i32_0 = arith.constant 0 : i32
    return %arg0, %c0_i32 : i32, i32
  }
}

</mosaic_0001>

<bundles_post_ra>
// kernel: tpu_custom_call.1
= control target key start
LH: loop header
LB: loop body
LE: loop exit
PB: predicated region body
PF: predicated region fallthrough
CT: control target
= control target key end

     0   :  { %vm86_vm0 = vcmask 1040384   ;;  %v648_v1 = vmov 0   ;;  %vm61_vm1 = vcmask 269312   ;;  %vm471_vm2 = vcmask 64512   ;;  %s898_s1 = inlined_call_operand.vmem [shape: bf16[33,36], index: 1, kind: input, shape index: {}]   ;;  %s899_s2 = inlined_call_operand.vmem [shape: f32[33,8], index: 2, kind: input, shape index: {}]   ;;  %s900_s0 = inlined_call_operand.vmem [shape: f32[128,33], index: 0, kind: input, shape index: {}]   ;;  %s901_s4 = inlined_call_operand.vmem [shape: f32[128,8], index: 4, kind: output, shape index: {1}]   ;;  %s902_s3 = inlined_call_operand.vmem [shape: bf16[128,36], index: 3, kind: output, shape index: {0}]  }
   0x1   :  { %v645_v0 = vld [vmem:[%s898_s1 + $0x10] ss:$0 sps:$4 sm:$0x11]   ;;  %v88_v2 = vsel %vm86_vm0, 65535, %v648_v1  ;;  %v274_v3 = vld [vmem:[%s899_s2 + $0x20] sm:$0x1] }
   0x2   :  { %v90_v4 = vand.u32 %v645_v0, %v88_v2  ;;  %610 = vmatprep.subr.msk.mxu1 %vm86_vm0, %v274_v3  ;;  %v646_v5 = vld [vmem:[%s898_s1 + $0x8] sm:$0xff]   ;;  %v273_v6 = vld [vmem:[%s899_s2 + $0x18] sm:$0xff]  ;;  %v272_v7 = vld [vmem:[%s899_s2 + $0x10] sm:$0xff]  ;;  %vm253_vm3 = vcmask 289792  }
   0x3   :  { %611 = vmatpush3.msk.msra.mxu1 %vm86_vm0, %v274_v3  ;;  %v17_v8 = vld [vmem:[%s900_s0] sm:$0xff]  ;;  %v271_v9 = vld [vmem:[%s899_s2 + $0x8] sm:$0xff]  ;;  %v19_v14 = vld [vmem:[%s900_s0 + $0x10] sm:$0xff] }
   0x4   :  { %588 = vmatprep.subr.bf16.mxu0 %v90_v4  ;;  %612 = vmatprep.subr.mxu1 %v273_v6  ;;  %v18_v10 = vld [vmem:[%s900_s0 + $0x8] sm:$0xff]  ;;  %v647_v11 = vld [vmem:[%s898_s1] sm:$0xff]   ;;  %v20_v15 = vld [vmem:[%s900_s0 + $0x18] sm:$0xff] }
   0x5   :  { %589 = vmatpush3.bf16.msra.mxu0 %v90_v4  ;;  %613 = vmatpush3.msra.mxu1 %v273_v6  ;;  %v33_v12 = vpack.c.bf16 %v18_v10, %v17_v8  ;;  %v270_v13 = vld [vmem:[%s899_s2] sm:$0xff]  ;;  %v22_v17 = vld [vmem:[%s900_s0 + $0x28] sm:$0xff]  ;;  %v34_v18 = vpack.c.bf16 %v20_v15, %v19_v14  ;;  %v23_v20 = vld [vmem:[%s900_s0 + $0x30] sm:$0xff] }
   0x6   :  { %590 = vmatprep.subr.bf16.mxu0 %v646_v5  ;;  %614 = vmatprep.subr.mxu1 %v272_v7  ;;  %v21_v16 = vld [vmem:[%s900_s0 + $0x20] sm:$0xff]  ;;  %v24_v21 = vld [vmem:[%s900_s0 + $0x38] sm:$0xff]  ;;  %v26_v23 = vld [vmem:[%s900_s0 + $0x48] sm:$0xff] }
   0x7   :  { %615 = vmatpush3.msra.mxu1 %v272_v7  ;;  %620 = vmatprep.mubr.msk.f32.mxu1 %vm61_vm1, %v17_v8  ;;  %v35_v19 = vpack.c.bf16 %v22_v17, %v21_v16  ;;  %v25_v22 = vld [vmem:[%s900_s0 + $0x40] sm:$0xff]  ;;  %v36_v24 = vpack.c.bf16 %v24_v21, %v23_v20  ;;  %v27_v26 = vld [vmem:[%s900_s0 + $0x50] sm:$0xff]  ;;  %v28_v27 = vld [vmem:[%s900_s0 + $0x58] sm:$0xff] }
   0x8   :  { %616 = vmatprep.subr.mxu1 %v271_v9  ;;  %594 = vmatprep.mubr.msk.bf16.mxu0 %vm61_vm1, %v33_v12  ;;  %v37_v25 = vpack.c.bf16 %v26_v23, %v25_v22  ;;  %v29_v28 = vld [vmem:[%s900_s0 + $0x60] sm:$0xff]  ;;  %v30_v29 = vld [vmem:[%s900_s0 + $0x68] sm:$0xff]  ;;  %v38_v30 = vpack.c.bf16 %v28_v27, %v27_v26  ;;  %v31_v32 = vld [vmem:[%s900_s0 + $0x70] sm:$0xff] }
   0x9   :  { %591 = vmatpush3.bf16.msra.mxu0 %v646_v5  ;;  %617 = vmatpush3.msra.mxu1 %v271_v9  ;;  %v39_v31 = vpack.c.bf16 %v30_v29, %v29_v28  ;;  %v32_v33 = vld [vmem:[%s900_s0 + $0x78] sm:$0xff] }
   0xa   :  { %592 = vmatprep.subr.bf16.mxu0 %v647_v11  ;;  %618 = vmatprep.subr.mxu1 %v270_v13  ;;  %v40_v34 = vpack.c.bf16 %v32_v33, %v31_v32 }
   0xb   :  { %619 = vmatpush3.msra.mxu1 %v270_v13 }
   0xc   :  { %621 = vmatmul.mubr.msk.f32.vlgmr.msra.gmra.mxu1 %vm61_vm1, %v18_v10 }
   0xd   :  { %593 = vmatpush3.bf16.msra.mxu0 %v647_v11  ;;  %623 = vmatprep.mubr.msk.f32.mxu1 %vm61_vm1, %v19_v14 }
  0x10   :  { %595 = vmatmul.mubr.msk.bf16.vlgmr.msra.gmra.mxu0 %vm61_vm1, %v34_v18  ;;  %624 = vmatmul.mubr.msk.f32.gmra.mxu1 %vm61_vm1, %v20_v15 }
  0x11   :  { %598 = vmatprep.mubr.msk.bf16.mxu0 %vm61_vm1, %v35_v19  ;;  %626 = vmatprep.mubr.msk.f32.mxu1 %vm61_vm1, %v21_v16 }
  0x14   :  { %627 = vmatmul.mubr.msk.f32.gmra.mxu1 %vm61_vm1, %v22_v17 }
  0x15   :  { %629 = vmatprep.mubr.msk.f32.mxu1 %vm61_vm1, %v23_v20 }
  0x18   :  { %599 = vmatmul.mubr.msk.bf16.gmra.mxu0 %vm61_vm1, %v36_v24  ;;  %630 = vmatmul.mubr.msk.f32.gmra.mxu1 %vm61_vm1, %v24_v21 }
  0x19   :  { %602 = vmatprep.mubr.msk.bf16.mxu0 %vm61_vm1, %v37_v25  ;;  %632 = vmatprep.mubr.msk.f32.mxu1 %vm61_vm1, %v25_v22 }
  0x1c   :  { %633 = vmatmul.mubr.msk.f32.gmra.mxu1 %vm61_vm1, %v26_v23 }
  0x1d   :  { %635 = vmatprep.mubr.msk.f32.mxu1 %vm61_vm1, %v27_v26 }
  0x20   :  { %603 = vmatmul.mubr.msk.bf16.gmra.mxu0 %vm61_vm1, %v38_v30  ;;  %636 = vmatmul.mubr.msk.f32.gmra.mxu1 %vm61_vm1, %v28_v27 }
  0x21   :  { %606 = vmatprep.mubr.msk.bf16.mxu0 %vm61_vm1, %v39_v31  ;;  %638 = vmatprep.mubr.msk.f32.mxu1 %vm61_vm1, %v29_v28 }
  0x24   :  { %639 = vmatmul.mubr.msk.f32.gmra.mxu1 %vm61_vm1, %v30_v29 }
  0x25   :  { %641 = vmatprep.mubr.msk.f32.mxu1 %vm61_vm1, %v31_v32 }
  0x28   :  { %607 = vmatmul.mubr.msk.bf16.gmra.mxu0 %vm61_vm1, %v40_v34  ;;  %642 = vmatmul.mubr.msk.f32.gmra.mxu1 %vm61_vm1, %v32_v33 }
  0xcc   :  { %v622_v35 = vpop.f32.mrf.mxu1 }
  0xcd   :  { %473 = vst.msk [vmem:[%s901_s4 + $0x8] sm:$0xff] %vm471_vm2, %v622_v35 }
  0xce   :  { %v392_v36 = vpop.f32.mrf.mxu1 }
  0xcf   :  { %472 = vst.msk [vmem:[%s901_s4] sm:$0xff] %vm471_vm2, %v392_v36 }
  0xd0   :  { %v596_v37 = vpop.f32.mrf.mxu0  ;;  %v625_v38 = vpop.f32.mrf.mxu1 }
  0xd1   :  { %v542_v39 = vpack.c.bf16 %v596_v37, %v596_v37  ;;  %475 = vst.msk [vmem:[%s901_s4 + $0x18] sm:$0xff] %vm471_vm2, %v625_v38 }
  0xd2   :  { %v126_v40 = vpop.f32.mrf.mxu0  ;;  %v402_v41 = vpop.f32.mrf.mxu1 }
  0xd3   :  { %256 = vst.msk [vmem:[%s902_s3 + $0x8] sm:$0xf] %vm253_vm3, %v542_v39  ;;  %v540_v42 = vpack.c.bf16 %v126_v40, %v126_v40 }
  0xd4   :  { %474 = vst.msk [vmem:[%s901_s4 + $0x10] sm:$0xff] %vm471_vm2, %v402_v41  ;;  %v597_v43 = vpop.f32.mrf.mxu0  ;;  %v628_v44 = vpop.f32.mrf.mxu1 }
  0xd5   :  { %254 = vst.msk [vmem:[%s902_s3] sm:$0xf] %vm253_vm3, %v540_v42  ;;  %v543_v45 = vpack.c.bf16 %v597_v43, %v597_v43 }
  0xd6   :  { %477 = vst.msk [vmem:[%s901_s4 + $0x28] sm:$0xff] %vm471_vm2, %v628_v44  ;;  %v129_v46 = vpop.f32.mrf.mxu0  ;;  %v412_v47 = vpop.f32.mrf.mxu1 }
  0xd7   :  { %257 = vst.msk [vmem:[%s902_s3 + $0xc] sm:$0xf] %vm253_vm3, %v543_v45  ;;  %v541_v48 = vpack.c.bf16 %v129_v46, %v129_v46 }
  0xd8   :  { %476 = vst.msk [vmem:[%s901_s4 + $0x20] sm:$0xff] %vm471_vm2, %v412_v47  ;;  %v600_v49 = vpop.f32.mrf.mxu0  ;;  %v631_v50 = vpop.f32.mrf.mxu1 }
  0xd9   :  { %255 = vst.msk [vmem:[%s902_s3 + $0x4] sm:$0xf] %vm253_vm3, %v541_v48  ;;  %v546_v51 = vpack.c.bf16 %v600_v49, %v600_v49 }
  0xda   :  { %479 = vst.msk [vmem:[%s901_s4 + $0x38] sm:$0xff] %vm471_vm2, %v631_v50  ;;  %v142_v52 = vpop.f32.mrf.mxu0  ;;  %v422_v53 = vpop.f32.mrf.mxu1 }
  0xdb   :  { %260 = vst.msk [vmem:[%s902_s3 + $0x18] sm:$0xf] %vm253_vm3, %v546_v51  ;;  %v544_v54 = vpack.c.bf16 %v142_v52, %v142_v52 }
  0xdc   :  { %478 = vst.msk [vmem:[%s901_s4 + $0x30] sm:$0xff] %vm471_vm2, %v422_v53  ;;  %v601_v55 = vpop.f32.mrf.mxu0  ;;  %v634_v56 = vpop.f32.mrf.mxu1 }
  0xdd   :  { %258 = vst.msk [vmem:[%s902_s3 + $0x10] sm:$0xf] %vm253_vm3, %v544_v54  ;;  %v547_v57 = vpack.c.bf16 %v601_v55, %v601_v55 }
  0xde   :  { %481 = vst.msk [vmem:[%s901_s4 + $0x48] sm:$0xff] %vm471_vm2, %v634_v56  ;;  %v145_v58 = vpop.f32.mrf.mxu0  ;;  %v432_v59 = vpop.f32.mrf.mxu1 }
  0xdf   :  { %261 = vst.msk [vmem:[%s902_s3 + $0x1c] sm:$0xf] %vm253_vm3, %v547_v57  ;;  %v545_v60 = vpack.c.bf16 %v145_v58, %v145_v58 }
  0xe0   :  { %480 = vst.msk [vmem:[%s901_s4 + $0x40] sm:$0xff] %vm471_vm2, %v432_v59  ;;  %v604_v61 = vpop.f32.mrf.mxu0  ;;  %v637_v62 = vpop.f32.mrf.mxu1 }
  0xe1   :  { %259 = vst.msk [vmem:[%s902_s3 + $0x14] sm:$0xf] %vm253_vm3, %v545_v60  ;;  %v550_v63 = vpack.c.bf16 %v604_v61, %v604_v61 }
  0xe2   :  { %483 = vst.msk [vmem:[%s901_s4 + $0x58] sm:$0xff] %vm471_vm2, %v637_v62  ;;  %v158_v0 = vpop.f32.mrf.mxu0  ;;  %v442_v1 = vpop.f32.mrf.mxu1 }
  0xe3   :  { %264 = vst.msk [vmem:[%s902_s3 + $0x28] sm:$0xf] %vm253_vm3, %v550_v63  ;;  %v548_v2 = vpack.c.bf16 %v158_v0, %v158_v0 }
  0xe4   :  { %482 = vst.msk [vmem:[%s901_s4 + $0x50] sm:$0xff] %vm471_vm2, %v442_v1  ;;  %v605_v3 = vpop.f32.mrf.mxu0  ;;  %v640_v4 = vpop.f32.mrf.mxu1 }
  0xe5   :  { %262 = vst.msk [vmem:[%s902_s3 + $0x20] sm:$0xf] %vm253_vm3, %v548_v2  ;;  %v551_v5 = vpack.c.bf16 %v605_v3, %v605_v3 }
  0xe6   :  { %485 = vst.msk [vmem:[%s901_s4 + $0x68] sm:$0xff] %vm471_vm2, %v640_v4  ;;  %v161_v6 = vpop.f32.mrf.mxu0  ;;  %v452_v7 = vpop.f32.mrf.mxu1 }
  0xe7   :  { %265 = vst.msk [vmem:[%s902_s3 + $0x2c] sm:$0xf] %vm253_vm3, %v551_v5  ;;  %v549_v8 = vpack.c.bf16 %v161_v6, %v161_v6 }
  0xe8   :  { %484 = vst.msk [vmem:[%s901_s4 + $0x60] sm:$0xff] %vm471_vm2, %v452_v7  ;;  %v608_v9 = vpop.f32.mrf.mxu0  ;;  %v643_v10 = vpop.f32.mrf.mxu1 }
  0xe9   :  { %263 = vst.msk [vmem:[%s902_s3 + $0x24] sm:$0xf] %vm253_vm3, %v549_v8  ;;  %v554_v11 = vpack.c.bf16 %v608_v9, %v608_v9 }
  0xea   :  { %487 = vst.msk [vmem:[%s901_s4 + $0x78] sm:$0xff] %vm471_vm2, %v643_v10  ;;  %v174_v12 = vpop.f32.mrf.mxu0  ;;  %v462_v13 = vpop.f32.mrf.mxu1 }
  0xeb   :  { %268 = vst.msk [vmem:[%s902_s3 + $0x38] sm:$0xf] %vm253_vm3, %v554_v11  ;;  %v552_v14 = vpack.c.bf16 %v174_v12, %v174_v12 }
  0xec   :  { %486 = vst.msk [vmem:[%s901_s4 + $0x70] sm:$0xff] %vm471_vm2, %v462_v13  ;;  %v609_v15 = vpop.f32.mrf.mxu0 }
  0xed   :  { %266 = vst.msk [vmem:[%s902_s3 + $0x30] sm:$0xf] %vm253_vm3, %v552_v14  ;;  %v555_v16 = vpack.c.bf16 %v609_v15, %v609_v15 }
  0xee   :  { %v177_v17 = vpop.f32.mrf.mxu0 }
  0xef   :  { %269 = vst.msk [vmem:[%s902_s3 + $0x3c] sm:$0xf] %vm253_vm3, %v555_v16  ;;  %v553_v18 = vpack.c.bf16 %v177_v17, %v177_v17 }
  0xf1   :  { %267 = vst.msk [vmem:[%s902_s3 + $0x34] sm:$0xf] %vm253_vm3, %v553_v18 }

</bundles_post_ra>
